<compile_context>
chip_gen: v7x
topology: tpu7x:2x2x1
jax: 0.10.0
libtpu: 0.0.40
codegen_flags: <defaults>
</compile_context>

<pallas_src>
import jax
import jax.numpy as jnp
from jax.experimental import pallas as pl
from jax.experimental.pallas import tpu as pltpu


def _se_kernel(x_ref, w1t_ref, b1_ref, w2_ref, b2_ref, out_ref):
    """One batch tile per grid step.

    x_ref  : (TN, C, HW)  activations, HW on lanes, C on sublanes
    w1t_ref: (C, Cm)      fc1 weight transposed to (in, out), pre-scaled by 1/(H*W)
    b1_ref : (1, Cm)      fc1 bias
    w2_ref : (C, Cm)      fc2 weight in (out, in) layout
    b2_ref : (C, 1)       fc2 bias
    out_ref: (TN, C, HW)  same dtype as x_ref
    """
    # ---- global average pool (1/(H*W) folded into w1) ----
    # keepdims keeps C on the sublane axis for the whole squeeze/excite path.
    pooled = jnp.sum(x_ref[...].astype(jnp.float32), axis=-1, keepdims=True)  # (TN, C, 1)

    # ---- fc1 + ReLU : VPU multiply + sublane reduction over C (no MXU) ----
    h1 = jnp.sum(pooled * w1t_ref[...][None, :, :], axis=1, keepdims=True)    # (TN, 1, Cm)
    h1 = jnp.maximum(h1 + b1_ref[...][None, :, :], 0.0)

    # ---- fc2 : VPU multiply + lane reduction over Cm (vectorized, no unroll) ----
    h2 = jnp.sum(h1 * w2_ref[...][None, :, :], axis=-1, keepdims=True)        # (TN, C, 1)
    h2 = h2 + b2_ref[...][None, :, :]

    # ---- sigmoid gate (EUP) ----
    gate = jax.nn.sigmoid(h2)                                                 # (TN, C, 1)

    # ---- channel-wise rescale; re-read x so the big block isn't held live ----
    out_ref[...] = (x_ref[...].astype(jnp.float32) * gate).astype(out_ref.dtype)


def se_module_pallas(x_nchw, w1, b1, w2, b2):
    """SEModule forward.

    x_nchw : (N, C, H, W)  any float dtype (f32 / bf16); output keeps this dtype
    w1     : (Cm, C)   == fc1.weight[:, :, 0, 0]
    b1     : (Cm,)     == fc1.bias
    w2     : (C, Cm)   == fc2.weight[:, :, 0, 0]
    b2     : (C,)      == fc2.bias
    """
    N, C, H, W = x_nchw.shape
    HW = H * W
    Cm = w1.shape[0]
    dtype = x_nchw.dtype

    # Lane-dense layout: pure reshape, HW (=256) on lanes, C on sublanes.
    x = x_nchw.reshape(N, C, HW)

    # Weights in f32; pooling factor folded into fc1.
    w1t = (w1.astype(jnp.float32).T / float(HW))        # (C, Cm)
    w2f = w2.astype(jnp.float32)                          # (C, Cm)
    b1r = b1.astype(jnp.float32).reshape(1, Cm)
    b2r = b2.astype(jnp.float32).reshape(C, 1)

    # ---- pick the batch tile TN: multi-MiB blocks, but keep >= 2 grid steps ----
    itemsize = jnp.dtype(dtype).itemsize
    per_sample = C * HW * itemsize                        # bytes per batch element
    target_block = 4 << 20                                # ~4 MiB per x block
    tn = max(1, min(N, target_block // max(per_sample, 1)))
    if N > 1:
        tn = min(tn, pl.cdiv(N, 2))                       # v7x: 2 TCs want >= 2 steps
    grid = (pl.cdiv(N, tn),)

    # Explicit VMEM budget: in + out, double-buffered, plus slack for weights.
    block_bytes = tn * per_sample
    vmem_limit = int(min(48 << 20, max(16 << 20, 4 * block_bytes + (4 << 20))))

    out = pl.pallas_call(
        _se_kernel,
        out_shape=jax.ShapeDtypeStruct((N, C, HW), dtype),
        grid=grid,
        in_specs=[
            pl.BlockSpec((tn, C, HW), lambda n: (n, 0, 0)),
            pl.BlockSpec((C, Cm), lambda n: (0, 0)),
            pl.BlockSpec((1, Cm), lambda n: (0, 0)),
            pl.BlockSpec((C, Cm), lambda n: (0, 0)),
            pl.BlockSpec((C, 1), lambda n: (0, 0)),
        ],
        out_specs=pl.BlockSpec((tn, C, HW), lambda n: (n, 0, 0)),
        compiler_params=pltpu.CompilerParams(
            dimension_semantics=("parallel",),
            vmem_limit_bytes=vmem_limit),
    )(x, w1t, b1r, w2f, b2r)

    return out.reshape(N, C, H, W)


def se_module_ref(x, w1, b1, w2, b2):
    """Pure-JAX reference (matches the PyTorch SEModule forward)."""
    xf = x.astype(jnp.float32)
    pooled = jnp.mean(xf, axis=(2, 3))                     # (N, C)
    h = jax.nn.relu(pooled @ w1.astype(jnp.float32).T + b1.astype(jnp.float32))
    g = jax.nn.sigmoid(h @ w2.astype(jnp.float32).T + b2.astype(jnp.float32))
    return (xf * g[:, :, None, None]).astype(x.dtype)


if __name__ == "__main__":
    key = jax.random.PRNGKey(0)
    kx, k1, k2, k3, k4 = jax.random.split(key, 5)

    # SEModule(channels=32, se_ratio=16) -> squeeze dim Cm = 2
    N, C, H, W = 2, 32, 16, 16
    se_ratio = 16
    Cm = C // se_ratio

    x = jax.random.normal(kx, (N, C, H, W), jnp.float32)
    w1 = 0.3 * jax.random.normal(k1, (Cm, C), jnp.float32)   # fc1 weight (out, in)
    b1 = 0.1 * jax.random.normal(k2, (Cm,), jnp.float32)     # fc1 bias
    w2 = 0.3 * jax.random.normal(k3, (C, Cm), jnp.float32)   # fc2 weight (out, in)
    b2 = 0.1 * jax.random.normal(k4, (C,), jnp.float32)      # fc2 bias

    out = se_module_pallas(x, w1, b1, w2, b2)
    out = jax.block_until_ready(out)
    assert out.shape == (N, C, H, W)
    assert out.dtype == x.dtype

    ref = se_module_ref(x, w1, b1, w2, b2)
    if not jnp.allclose(out, ref, atol=1e-4, rtol=1e-4):
        max_err = float(jnp.max(jnp.abs(out - ref)))
        raise AssertionError(f"mismatch vs reference, max abs err={max_err}")

    print("KERNEL_OK")
</pallas_src>

<mosaic_0001>
module attributes {stable_mosaic.version = 11 : i64} {
  func.func @_se_kernel(%arg0: i32, %arg1: memref<1x32x256xf32, #tpu.memory_space<vmem>>, %arg2: memref<32x2xf32, #tpu.memory_space<vmem>>, %arg3: memref<1x2xf32, #tpu.memory_space<vmem>>, %arg4: memref<32x2xf32, #tpu.memory_space<vmem>>, %arg5: memref<32x1xf32, #tpu.memory_space<vmem>>, %arg6: memref<1x32x256xf32, #tpu.memory_space<vmem>>) attributes {dimension_semantics = [#tpu.dimension_semantics<parallel>], iteration_bounds = array<i64: 2>, scalar_prefetch = 0 : i64, scratch_operands = 0 : i64, tpu.core_type = #tpu.core_type<tc>, window_params = [{transform_indices = @transform_0, window_bounds = array<i64: 1, 32, 256>}, {pipeline_mode = #tpu.pipeline_mode<synchronous>, transform_indices = @transform_1, window_bounds = array<i64: 32, 2>}, {pipeline_mode = #tpu.pipeline_mode<synchronous>, transform_indices = @transform_2, window_bounds = array<i64: 1, 2>}, {pipeline_mode = #tpu.pipeline_mode<synchronous>, transform_indices = @transform_3, window_bounds = array<i64: 32, 2>}, {pipeline_mode = #tpu.pipeline_mode<synchronous>, transform_indices = @transform_4, window_bounds = array<i64: 32, 1>}, {transform_indices = @transform_5, window_bounds = array<i64: 1, 32, 256>}]} {
    %c0 = arith.constant 0 : index
    %c0_0 = arith.constant 0 : index
    %c0_1 = arith.constant 0 : index
    %0 = vector.load %arg1[%c0, %c0_0, %c0_1] : memref<1x32x256xf32, #tpu.memory_space<vmem>>, vector<1x32x256xf32>
    %cst = arith.constant dense<0.000000e+00> : vector<1x32xf32>
    %1 = vector.multi_reduction <add>, %0, %cst [2] : vector<1x32x256xf32> to vector<1x32xf32>
    %2 = vector.shape_cast %1 : vector<1x32xf32> to vector<1x32x1xf32>
    %c0_2 = arith.constant 0 : index
    %c0_3 = arith.constant 0 : index
    %3 = vector.load %arg2[%c0_2, %c0_3] : memref<32x2xf32, #tpu.memory_space<vmem>>, vector<32x2xf32>
    %4 = vector.shape_cast %3 : vector<32x2xf32> to vector<1x32x2xf32>
    %5 = vector.broadcast %2 : vector<1x32x1xf32> to vector<1x32x2xf32>
    %6 = arith.mulf %5, %4 : vector<1x32x2xf32>
    %cst_4 = arith.constant dense<0.000000e+00> : vector<1x2xf32>
    %7 = vector.multi_reduction <add>, %6, %cst_4 [1] : vector<1x32x2xf32> to vector<1x2xf32>
    %8 = vector.shape_cast %7 : vector<1x2xf32> to vector<1x1x2xf32>
    %c0_5 = arith.constant 0 : index
    %c0_6 = arith.constant 0 : index
    %9 = vector.load %arg3[%c0_5, %c0_6] : memref<1x2xf32, #tpu.memory_space<vmem>>, vector<1x2xf32>
    %10 = vector.shape_cast %9 : vector<1x2xf32> to vector<1x1x2xf32>
    %11 = arith.addf %8, %10 : vector<1x1x2xf32>
    %cst_7 = arith.constant 0.000000e+00 : f32
    %12 = vector.broadcast %cst_7 : f32 to vector<1x1x2xf32>
    %13 = arith.maximumf %11, %12 : vector<1x1x2xf32>
    %c0_8 = arith.constant 0 : index
    %c0_9 = arith.constant 0 : index
    %14 = vector.load %arg4[%c0_8, %c0_9] : memref<32x2xf32, #tpu.memory_space<vmem>>, vector<32x2xf32>
    %15 = vector.shape_cast %14 : vector<32x2xf32> to vector<1x32x2xf32>
    %16 = vector.broadcast %13 : vector<1x1x2xf32> to vector<1x32x2xf32>
    %17 = arith.mulf %16, %15 : vector<1x32x2xf32>
    %cst_10 = arith.constant dense<0.000000e+00> : vector<1x32xf32>
    %18 = vector.multi_reduction <add>, %17, %cst_10 [2] : vector<1x32x2xf32> to vector<1x32xf32>
    %19 = vector.shape_cast %18 : vector<1x32xf32> to vector<1x32x1xf32>
    %c0_11 = arith.constant 0 : index
    %c0_12 = arith.constant 0 : index
    %20 = vector.load %arg5[%c0_11, %c0_12] : memref<32x1xf32, #tpu.memory_space<vmem>>, vector<32x1xf32>
    %21 = vector.shape_cast %20 : vector<32x1xf32> to vector<1x32x1xf32>
    %22 = arith.addf %19, %21 : vector<1x32x1xf32>
    %23 = arith.negf %22 : vector<1x32x1xf32>
    %24 = math.exp %23 : vector<1x32x1xf32>
    %cst_13 = arith.constant 1.000000e+00 : f32
    %25 = vector.broadcast %cst_13 : f32 to vector<1x32x1xf32>
    %26 = arith.addf %25, %24 : vector<1x32x1xf32>
    %27 = arith.divf %25, %26 : vector<1x32x1xf32>
    %c0_14 = arith.constant 0 : index
    %c0_15 = arith.constant 0 : index
    %c0_16 = arith.constant 0 : index
    %28 = vector.load %arg1[%c0_14, %c0_15, %c0_16] : memref<1x32x256xf32, #tpu.memory_space<vmem>>, vector<1x32x256xf32>
    %29 = vector.broadcast %27 : vector<1x32x1xf32> to vector<1x32x256xf32>
    %30 = arith.mulf %28, %29 : vector<1x32x256xf32>
    %c0_17 = arith.constant 0 : index
    %c0_18 = arith.constant 0 : index
    %c0_19 = arith.constant 0 : index
    %31 = vector.load %arg6[%c0_17, %c0_18, %c0_19] : memref<1x32x256xf32, #tpu.memory_space<vmem>>, vector<1x32x256xf32>
    tpu.vector_store %arg6[%c0_17, %c0_18, %c0_19], %30 {strides = array<i32>} : memref<1x32x256xf32, #tpu.memory_space<vmem>>, vector<1x32x256xf32>,
    return
  }
  func.func @transform_0(%arg0: i32) -> (i32, i32, i32) {
    %c0_i32 = arith.constant 0 : i32
    %c0_i32_0 = arith.constant 0 : i32
    %c0_i32_1 = arith.constant 0 : i32
    return %arg0, %c0_i32, %c0_i32_0 : i32, i32, i32
  }
  func.func @transform_1(%arg0: i32) -> (i32, i32) {
    %c0_i32 = arith.constant 0 : i32
    %c0_i32_0 = arith.constant 0 : i32
    %c0_i32_1 = arith.constant 0 : i32
    return %c0_i32, %c0_i32_0 : i32, i32
  }
  func.func @transform_2(%arg0: i32) -> (i32, i32) {
    %c0_i32 = arith.constant 0 : i32
    %c0_i32_0 = arith.constant 0 : i32
    %c0_i32_1 = arith.constant 0 : i32
    return %c0_i32, %c0_i32_0 : i32, i32
  }
  func.func @transform_3(%arg0: i32) -> (i32, i32) {
    %c0_i32 = arith.constant 0 : i32
    %c0_i32_0 = arith.constant 0 : i32
    %c0_i32_1 = arith.constant 0 : i32
    return %c0_i32, %c0_i32_0 : i32, i32
  }
  func.func @transform_4(%arg0: i32) -> (i32, i32) {
    %c0_i32 = arith.constant 0 : i32
    %c0_i32_0 = arith.constant 0 : i32
    %c0_i32_1 = arith.constant 0 : i32
    return %c0_i32, %c0_i32_0 : i32, i32
  }
  func.func @transform_5(%arg0: i32) -> (i32, i32, i32) {
    %c0_i32 = arith.constant 0 : i32
    %c0_i32_0 = arith.constant 0 : i32
    %c0_i32_1 = arith.constant 0 : i32
    return %arg0, %c0_i32, %c0_i32_0 : i32, i32, i32
  }
}

</mosaic_0001>

<bundles_post_ra>
// kernel: tpu_custom_call.1
= control target key start
LH: loop header
LB: loop body
LE: loop exit
PB: predicated region body
PF: predicated region fallthrough
CT: control target
= control target key end

     0   :  { %10 = vsyncpa [#allocation3], 0  ;;  %s936_s0 = inlined_call_operand.hbm [shape: f32[2,32,256], index: 0, kind: input, shape index: {}]   ;;  %s937_s1 = inlined_call_operand.vmem [shape: f32[32,2], index: 1, kind: input, shape index: {}]   ;;  %s938_s2 = inlined_call_operand.vmem [shape: f32[1,2], index: 2, kind: input, shape index: {}]   ;;  %s939_s3 = inlined_call_operand.vmem [shape: f32[32,2], index: 3, kind: input, shape index: {}]   ;;  %s940_s4 = inlined_call_operand.vmem [shape: f32[32,1], index: 4, kind: input, shape index: {}]   ;;  %s941_s5 = inlined_call_operand.hbm [shape: f32[2,32,256], index: 5, kind: output, shape index: {}]  }
   0x1   :  { %12 = vsyncpa [#allocation3 + $0x1], 0 }
   0x2   :  { %13 = vsyncpa [#allocation4], 0 }
   0x3   :  { %15 = vsyncpa [#allocation4 + $0x1], 0  ;;  %s691_s18 = smov 0   ;;  %s693_s19 = smov 0  }
   0x4   :  { %s695_s20 = smov 0   ;;  %s697_s21 = smov 0  }
   0x5 LB: > { %s712_s22 = sadd.s32 4294967295, %s652_s21   ;;  %s467_s23 = sadd.s32 4294967294, %s652_s21   ;;  %s652_s21 = sphi %s697_s21, %s954_s21   ;;  %s648_s20 = sphi %s695_s20, %s953_s20   ;;  %s644_s19 = sphi %s693_s19, %s952_s19   ;;  %s640_s18 = sphi %s691_s18, %s951_s18  }
   0x6   : > { %s716_s24 = sadd.s32 1, %s652_s21   ;;  %s28_s25 = sadd.s32 1, %s648_s20 }
   0x7   : > { %s25_s26 = ssub.s32 %s652_s21, %s716_s24  ;;  %p35_p0 = scmp.ne.s32.totalorder %s648_s20, %s644_s19 }
   0x8   : > { %p26_p1 = scmp.eq.s32.totalorder %s25_s26, 0  ;;  %p36_p2 = scmp.eq.s32.totalorder %s652_s21, 0 }
   0x9   : > { %p41_p3 = scmp.ne.s32.totalorder %s644_s19, %s640_s18  ;;  %p42_p4 = scmp.eq.s32.totalorder %s712_s22, 0 }
   0xa   : > { %s728_s27 = scalar_select %p26_p1, %s648_s20, %s28_s25  }
   0xb   : > { %p730_p5 = por %p36_p2, %p35_p0  ;;  %p734_p6 = por %p42_p4, %p41_p3 }
   0xc   : > { %p149_p7 = scmp.eq.s32.totalorder %s712_s22, 1  ;;  %p155_p8 = scmp.eq.s32.totalorder %s467_s23, 1 }
   0xd   : > { %p499_p10 = scmp.lt.s32.totalorder %s652_s21, 2  ;;  %s187_s7 = sand.u32 1, %s648_s20  }
   0xe   : > { %p741_p11 = por %p149_p7, %p35_p0  ;;  %p745_p12 = por %p155_p8, %p41_p3 }
   0xf   : > { %s485_s8 = sshll.u32 %s652_s21, 10  ;;  %s470_s9 = sshll.u32 %s187_s7, 6 }
  0x10   : > { %s945_s30 = scalar_select %p741_p11, 1, 0 }
  0x11   : > { %s946_s6 = scalar_select %p745_p12, 1, 0 }
  0x12   : > { %s754_s12 = scalar_lea.hbm %s936_s0, %s485_s8  ;;  %s191_s13 = scalar_lea.vmem [#allocation2], %s470_s9 }
  0x13   : > { %s198_s14 = sshll.u32 %s191_s13, 4  ;;  %p758_p13 = pnand %p499_p10, %p730_p5  ;;  %s762_s14 = int_to_ptr.vmem [resolvable:$true] %s198_s14 }
  0x14   : > { %s764_s16 = scalar_lea.sflag [#allocation3], %s187_s7  ;;  %s556_s17 = scalar_lea.hbm %s754_s12, 1024 }
  0x15   : > { %p557_p0 = scmp.ne.s32.totalorder %s754_s12, %s556_s17  ;;  %p558_p1 = pneg %p758_p13 }
  0x16   : > { %s561_s26 = scalar_lea.hbm %s936_s0, 2048  ;;  %p562_p4 = scmp.lt.u32.totalorder %s754_s12, %s936_s0 }
  0x17   : > { %p559_p2 = pnand %p558_p1, %p557_p0  ;;  %p563_p5 = scmp.lt.u32.totalorder %s561_s26, %s556_s17 }
  0x18   : > { %p565_p8 = scmp.lt.u32.totalorder %s556_s17, %s754_s12 }
  0x19   : > { %p560_p3 = pneg %p559_p2  ;;  %p564_p7 = por %p563_p5, %p562_p4 }
  0x1b   : > { %p566_p10 = por %p565_p8, %p564_p7 }
  0x1d   : > { %p567_p9 = pnand %p566_p10, %p560_p3 }
  0x1f   : > { %570 = shalt.err (!%p567_p9)
}
  0x20   : > { %s571_s7 = scalar_lea.vmem %s762_s14, 1024  ;;  %s654_s9 = smov [#allocation2]  }
  0x21   : > { %p572_p0 = scmp.ne.s32.totalorder %s762_s14, %s571_s7  ;;  %s576_s10 = sshll.u32 %s654_s9, 4  ;;  %s577_s10 = int_to_ptr.vmem [resolvable:$false] %s576_s10 }
  0x22   : > { %s578_s11 = scalar_lea.vmem %s577_s10, 2048  ;;  %p579_p11 = scmp.lt.s32.totalorder %s762_s14, %s577_s10 }
  0x23   : > { %p574_p2 = pnand %p572_p0, %p558_p1  ;;  %p580_p4 = scmp.lt.s32.totalorder %s578_s11, %s571_s7 }
  0x25   : > { %p575_p12 = pneg %p574_p2  ;;  %p581_p5 = por %p580_p4, %p579_p11 }
  0x27   : > { %p582_p7 = pnand %p581_p5, %p575_p12 }
  0x29   : > { %585 = shalt.err (!%p582_p7)
}
  0x2a   : > { %s655_s13 = smov 256   ;;  %s656_s17 = smov 16  }
  0x2b   : > { %494 = dma.hbm_to_vmem [thread:$0]  (!%p758_p13), %s754_s12, 1024, %s762_s14, %s764_s16, %s655_s13, %s655_s13, %s656_s17  }
  0x2c   : > { %p473_p9 = scmp.ge.s32.totalorder %s652_s21, 1  ;;  %p206_p1 = scmp.lt.s32.totalorder %s652_s21, 3 }
  0x2e   : > { %p207_p3 = pnand %p473_p9, %p206_p1 }
  0x2f   : > { %s795_s23 = sand.u32 (!%p207_p3), 1, %s644_s19  }
  0x30   : > { %210 = sbr.rel (%p207_p3) target bundleno = 559 (0x22f), region = 40  ;;  %s474_s25 = sshll.u32 (!%p207_p3), %s795_s23, 6 }
  0x31   : > { %s213_s26 = scalar_lea.sflag (!%p207_p3), [#allocation3], %s795_s23  ;;  %s216_s28 = scalar_lea.vmem (!%p207_p3), [#allocation2], %s474_s25 }
  0x37   : > { %631 = dma.done.wait (%p734_p6), %s213_s26, 1024  }
  0x38   : > { %633 = vsyncadd (%p734_p6), %s213_s26, 4294966272  ;;  %v805_v0 = vld [vmem:[%s216_s28] sm:$0xff]  ;;  %v807_v1 = vld [vmem:[%s216_s28 + $0x8] sm:$0xff]  ;;  %vm271_vm0 = vcmask 15360   ;;  %v292_v34 = vlaneseq  ;;  %v657_v56 = vmov 0   ;;  %s242_s26 = scalar_lea.vmem [#allocation5], %s474_s25 }
  0x39   : > { %v809_v2 = vld [vmem:[%s216_s28 + $0x20] sm:$0xff]  ;;  %v251_v3 = vadd.f32 %v807_v1, %v805_v0  ;;  %v813_v4 = vld [vmem:[%s216_s28 + $0x28] sm:$0xff]  ;;  %v815_v5 = vld [vmem:[%s216_s28 + $0x10] sm:$0xff]  ;;  %539 = vset.pattern.permute.xlu1 %v657_v56  ;;  %538 = vset.pattern.permute.xlu0 %v657_v56  ;;  %s486_s29 = sshll.u32 %s712_s22, 10  ;;  %s381_s22 = scalar_lea.sflag [#allocation4], %s795_s23 }
  0x3a   : > { %v817_v6 = vld [vmem:[%s216_s28 + $0x18] sm:$0xff]  ;;  %v257_v7 = vadd.f32 %v813_v4, %v809_v2  ;;  %v821_v8 = vld [vmem:[%s216_s28 + $0x30] sm:$0xff]  ;;  %v263_v12 = vld [vmem:[%s937_s1] sm:$0xff]  ;;  %v293_v37 = vshrl.u32 %v292_v34, 7  ;;  %s890_s14 = scalar_lea.hbm %s941_s5, %s486_s29  ;;  %p948_p11 = scmp.ne.s32.totalorder %s945_s30, 0 }
  0x3b   : > { %v823_v9 = vld [vmem:[%s216_s28 + $0x38] sm:$0xff]  ;;  %252 = vadd.xlane.f32.xlu0 %v251_v3  ;;  %v254_v10 = vadd.f32 %v817_v6, %v815_v5  ;;  %v265_v15 = vld [vmem:[%s937_s1 + $0x10] sm:$0xff]  ;;  %v264_v16 = vld [vmem:[%s937_s1 + $0x8] sm:$0xff]  ;;  %s394_s28 = sshll.u32 %s242_s26, 4  ;;  %s658_s16 = smov [#allocation5]   ;;  %s885_s28 = int_to_ptr.vmem [resolvable:$true] %s394_s28 }
  0x3c   : > { %258 = vadd.xlane.f32.xlu1 %v257_v7  ;;  %v260_v11 = vadd.f32 %v823_v9, %v821_v8  ;;  %v266_v18 = vld [vmem:[%s937_s1 + $0x18] sm:$0xff]  ;;  %v285_v38 = vld [vmem:[%s938_s2] sm:$0x1]  ;;  %v294_v41 = vsub.s32 0, %v293_v37  ;;  %v289_v43 = vld [vmem:[%s939_s3 + $0x8] sm:$0xff]  ;;  %s586_s15 = scalar_lea.vmem %s885_s28, 1024 }
  0x3d   : > { %v288_v44 = vld [vmem:[%s939_s3] sm:$0xff]  ;;  %v291_v46 = vld [vmem:[%s939_s3 + $0x18] sm:$0xff]  ;;  %v290_v47 = vld [vmem:[%s939_s3 + $0x10] sm:$0xff]  ;;  %p587_p6 = scmp.ne.s32.totalorder %s885_s28, %s586_s15  ;;  %s590_s8 = sshll.u32 %s658_s16, 4  ;;  %s591_s8 = int_to_ptr.vmem [resolvable:$false] %s590_s8 }
  0x3e   : > { %v313_v57 = vld [vmem:[%s940_s4 + $0x8] sm:$0xff]  ;;  %v312_v58 = vld [vmem:[%s940_s4] sm:$0xff]  ;;  %v315_v63 = vld [vmem:[%s940_s4 + $0x18] sm:$0xff]  ;;  %s592_s7 = scalar_lea.vmem %s591_s8, 2048  ;;  %p593_p8 = scmp.lt.s32.totalorder %s885_s28, %s591_s8 }
  0x3f   : > { %255 = vadd.xlane.f32.xlu0 %v254_v10  ;;  %v314_v3 = vld [vmem:[%s940_s4 + $0x10] sm:$0xff]  ;;  %p588_p12 = pnand %p587_p6, %p948_p11  ;;  %p594_p10 = scmp.lt.s32.totalorder %s592_s7, %s586_s15 }
  0x40   : > { %261 = vadd.xlane.f32.xlu1 %v260_v11 }
  0x41   : > { %p589_p13 = pneg %p588_p12  ;;  %p595_p0 = por %p594_p10, %p593_p8 }
  0x43   : > { %p596_p2 = pnand %p595_p0, %p589_p13 }
  0xc8   : > { %v253_v13 = vpop.xlane.xlu0 %252 }
  0xc9   : > { %v259_v14 = vpop.xlane.xlu1 %258  ;;  %v267_v17 = vmul.f32 %v263_v12, %v253_v13 }
  0xca   : > { %v269_v20 = vmul.f32 %v265_v15, %v259_v14 }
  0xcb   : > { %v272_v24 = vsel %vm271_vm0, %v267_v17, 0.0 }
  0xcc   : > { %v256_v19 = vpop.xlane.xlu0 %255  ;;  %v275_v27 = vsel %vm271_vm0, %v269_v20, 0.0 }
  0xcd   : > { %v268_v21 = vmul.f32 %v264_v16, %v256_v19  ;;  %v262_v22 = vpop.xlane.xlu1 %261 }
  0xce   : > { %v270_v23 = vmul.f32 %v266_v18, %v262_v22 }
  0xcf   : > { %v273_v25 = vsel %vm271_vm0, %v268_v21, 0.0 }
  0xd0   : > { %v274_v26 = vadd.f32 %v273_v25, %v272_v24  ;;  %v277_v28 = vsel %vm271_vm0, %v270_v23, 0.0 }
  0xd2   : > { %v276_v29 = vadd.f32 %v275_v27, %v274_v26 }
  0xd4   : > { %v278_v30 = vadd.f32 %v277_v28, %v276_v29 }
  0xd6   : > { %v279_v31 = vrot.slane %v278_v30, 4 }
  0xd8   : > { %v280_v32 = vadd.f32 %v279_v31, %v278_v30 }
  0xda   : > { %v281_v33 = vrot.slane %v280_v32, 2 }
  0xdc   : > { %v282_v35 = vadd.f32 %v281_v33, %v280_v32 }
  0xde   : > { %v283_v36 = vrot.slane %v282_v35, 1 }
  0xe0   : > { %v284_v39 = vadd.f32 %v283_v36, %v282_v35 }
  0xe2   : > { %v286_v40 = vadd.f32 %v285_v38, %v284_v39 }
  0xe4   : > { %v287_v42 = vmax.f32 %v286_v40, 0.0 }
  0xe6   : > { %v295_v45 = vrot.slane %v287_v42, %v294_v41 }
  0xe8   : > { %v297_v48 = vmul.f32 %v295_v45, %v289_v43  ;;  %v296_v49 = vmul.f32 %v295_v45, %v288_v44  ;;  %v299_v52 = vmul.f32 %v295_v45, %v291_v46  ;;  %v298_v53 = vmul.f32 %v295_v45, %v290_v47 }
  0xea   : > { %v303_v50 = vsel %vm271_vm0, %v297_v48, 0.0  ;;  %v300_v51 = vsel %vm271_vm0, %v296_v49, 0.0  ;;  %v309_v54 = vsel %vm271_vm0, %v299_v52, 0.0  ;;  %v306_v55 = vsel %vm271_vm0, %v298_v53, 0.0 }
  0xeb   : > { %304 = vadd.xlane.f32.xlu1 %v303_v50  ;;  %301 = vadd.xlane.f32.xlu0 %v300_v51 }
  0xef   : > { %310 = vadd.xlane.f32.xlu1 %v309_v54  ;;  %307 = vadd.xlane.f32.xlu0 %v306_v55 }
 0x178   : > { %v305_v59 = vpop.xlane.xlu1 %304  ;;  %v302_v60 = vpop.xlane.xlu0 %301 }
 0x179   : > { %v317_v61 = vadd.f32 %v313_v57, %v305_v59  ;;  %v316_v62 = vadd.f32 %v312_v58, %v302_v60 }
 0x17b   : > { %v477_v7 = vmul.f32 -1.442695, %v317_v61  ;;  %v476_v10 = vmul.f32 -1.442695, %v316_v62 }
 0x17c   : > { %v311_v11 = vpop.xlane.xlu1 %310  ;;  %v308_v12 = vpop.xlane.xlu0 %307 }
 0x17d   : > { %540 = vpow2.f32 %v477_v7  ;;  %v319_v13 = vadd.f32 %v315_v63, %v311_v11  ;;  %v318_v14 = vadd.f32 %v314_v3, %v308_v12 }
 0x17e   : > { %542 = vpow2.f32 %v476_v10 }
 0x17f   : > { %v479_v15 = vmul.f32 -1.442695, %v319_v13  ;;  %v478_v16 = vmul.f32 -1.442695, %v318_v14 }
 0x181   : > { %544 = vpow2.f32 %v479_v15 }
 0x182   : > { %546 = vpow2.f32 %v478_v16 }
 0x187   : > { %v541_v17 = vpop.eup %540 }
 0x188   : > { %v543_v18 = vpop.eup %542  ;;  %v333_v19 = vadd.f32 1.0, %v541_v17 }
 0x189   : > { %v332_v20 = vadd.f32 1.0, %v543_v18 }
 0x18a   : > { %548 = vrcp.f32 %v333_v19 }
 0x18b   : > { %v545_v21 = vpop.eup %544  ;;  %550 = vrcp.f32 %v332_v20 }
 0x18c   : > { %v547_v22 = vpop.eup %546  ;;  %v335_v24 = vadd.f32 1.0, %v545_v21 }
 0x18d   : > { %v334_v23 = vadd.f32 1.0, %v547_v22 }
 0x18f   : > { %552 = vrcp.f32 %v334_v23 }
 0x190   : > { %554 = vrcp.f32 %v335_v24 }
 0x194   : > { %v549_v25 = vpop.eup %548 }
 0x195   : > { %v551_v26 = vpop.eup %550  ;;  %351 = vperm.xlu1 %539, %v549_v25  }
 0x196   : > { %346 = vperm.xlu0 %538, %v551_v26  }
 0x199   : > { %v553_v27 = vpop.eup %552 }
 0x19a   : > { %356 = vperm.xlu1 %539, %v553_v27   ;;  %v555_v28 = vpop.eup %554 }
 0x19e   : > { %361 = vperm.xlu1 %539, %v555_v28  }
 0x214   : > { %v352_v29 = vpop.permute.xlu1 %351 }
 0x215   : > { %v366_v30 = vmul.f32 %v352_v29, %v815_v5  ;;  %v367_v31 = vmul.f32 %v352_v29, %v817_v6  ;;  %v347_v32 = vpop.permute.xlu0 %346 }
 0x216   : > { %v364_v33 = vmul.f32 %v347_v32, %v805_v0  ;;  %v365_v34 = vmul.f32 %v347_v32, %v807_v1 }
 0x217   : > { %374 = vst [vmem:[%s242_s26 + $0x10] sm:$0xff] %v366_v30  ;;  %375 = vst [vmem:[%s242_s26 + $0x18] sm:$0xff] %v367_v31 }
 0x218   : > { %372 = vst [vmem:[%s242_s26] sm:$0xff] %v364_v33  ;;  %373 = vst [vmem:[%s242_s26 + $0x8] sm:$0xff] %v365_v34 }
 0x219   : > { %v357_v35 = vpop.permute.xlu1 %356 }
 0x21a   : > { %v368_v36 = vmul.f32 %v357_v35, %v809_v2  ;;  %v369_v5 = vmul.f32 %v357_v35, %v813_v4 }
 0x21c   : > { %376 = vst [vmem:[%s242_s26 + $0x20] sm:$0xff] %v368_v36  ;;  %377 = vst [vmem:[%s242_s26 + $0x28] sm:$0xff] %v369_v5 }
 0x21d   : > { %v362_v0 = vpop.permute.xlu1 %361 }
 0x21e   : > { %v370_v1 = vmul.f32 %v362_v0, %v821_v8  ;;  %v371_v2 = vmul.f32 %v362_v0, %v823_v9 }
 0x220   : > { %378 = vst [vmem:[%s242_s26 + $0x30] sm:$0xff] %v370_v1  ;;  %379 = vst [vmem:[%s242_s26 + $0x38] sm:$0xff] %v371_v2 }
 0x221   : > { %599 = shalt.err (!%p596_p2)
}
 0x222   : > { %s600_s9 = scalar_lea.hbm %s890_s14, 1024  ;;  %s604_s13 = scalar_lea.hbm %s941_s5, 2048 }
 0x223   : > { %p601_p4 = scmp.ne.s32.totalorder %s890_s14, %s600_s9  ;;  %p605_p9 = scmp.lt.u32.totalorder %s890_s14, %s941_s5 }
 0x224   : > { %p606_p1 = scmp.lt.u32.totalorder %s604_s13, %s600_s9  ;;  %p608_p6 = scmp.lt.u32.totalorder %s600_s9, %s890_s14 }
 0x225   : > { %p602_p5 = pnand %p601_p4, %p948_p11 }
 0x226   : > { %p607_p3 = por %p606_p1, %p605_p9 }
 0x227   : > { %p603_p7 = pneg %p602_p5 }
 0x228   : > { %p609_p12 = por %p608_p6, %p607_p3 }
 0x22a   : > { %p610_p13 = pnand %p609_p12, %p603_p7 }
 0x22c   : > { %613 = shalt.err (!%p610_p13)
}
 0x22d   : > { %s659_s29 = smov 256   ;;  %s660_s25 = smov 16  }
 0x22e   : > { %489 = dma.vmem_to_hbm [thread:$0]  (%p948_p11), %s885_s28, 1024, %s890_s14, %s381_s22, %s659_s29, %s659_s29, %s660_s25  }
 0x22f PF: > { %s409_s12 = sand.u32 1, %s640_s18   ;;  %p949_p8 = scmp.ne.s32.totalorder %s946_s6, 0 }
 0x230   : > { %p950_p10 = scmp.ge.s32.totalorder %s652_s21, 2  ;;  %s410_s15 = scalar_lea.sflag [#allocation4], %s409_s12 }
 0x232   : > { %p496_p0 = pnand %p950_p10, %p949_p8 }
 0x234   : > { %635 = dma.done.wait (!%p496_p0), %s410_s15, 1024  }
 0x235   : > { %637 = vsyncadd (!%p496_p0), %s410_s15, 4294966272  ;;  %p18_p2 = scmp.ge.s32.totalorder %s716_s24, 4   ;;  %s951_s18 = smov %s644_s19 }
 0x236   : > { %s952_s19 = smov %s648_s20  ;;  %s953_s20 = smov %s728_s27 }
 0x237   : > { %s954_s21 = smov %s716_s24  ;;  %20 = sbr.rel (!%p18_p2) target bundleno = 5 (0x5), region = 85 }
 0x23e   :  { %415 = vsyncpa [#allocation3], 1 }
 0x23f   :  { %417 = vsyncpa [#allocation3 + $0x1], 1 }
 0x240   :  { %418 = vsyncpa [#allocation4], 1 }
 0x241   :  { %420 = vsyncpa [#allocation4 + $0x1], 1 }

</bundles_post_ra>
